<compile_context>
chip_gen: v5e
topology: v5e:2x2
jax: 0.10.0
libtpu: 0.0.40
codegen_flags: <defaults>
</compile_context>

<pallas_src>
import functools
import math

import jax
import jax.numpy as jnp
from jax.experimental import pallas as pl
from jax.experimental.pallas import tpu as pltpu

_LN10000 = math.log(10000.0)


# --------------------------------------------------------------------------
# Kernels
# --------------------------------------------------------------------------
def _pe_const_kernel(const_ref, o_ref, *, per_row: int):
    """PE tile driven by precomputed per-lane / per-column constants.

    const_ref: (3, W) f32 rows = [inv_denom, sub_pos, is_even].
    o_ref:     (TILE, W) output tile.  The PE position of element (r, w) is
               (block_row0 + r) * per_row + sub_pos[w]; its column's inverse
               denominator is inv_denom[w]; is_even selects sin vs cos.
    """
    tl, _ = o_ref.shape
    inv_denom = const_ref[0:1, :]                       # (1, W)
    sub_pos = const_ref[1:2, :]                         # (1, W)
    is_even = const_ref[2:3, :] > 0.5                   # (1, W) bool
    row0 = pl.program_id(0) * tl
    row = (jax.lax.broadcasted_iota(jnp.int32, (tl, 1), 0) + row0).astype(jnp.float32)
    pos = row * jnp.float32(per_row) + sub_pos          # exact integer-valued f32
    arg = pos * inv_denom
    o_ref[...] = jnp.where(is_even, jnp.sin(arg), jnp.cos(arg)).astype(o_ref.dtype)


def _pe_flat_general_kernel(o_ref, *, d_model: int):
    """(TILE_R, 128) tile of the row-major-flattened PE table, any even D.

    pos = idx // D and col = idx % D with a static D strength-reduce to
    multiply+shift on the VALU; inv_denom costs one exp per element (EUP).
    """
    tr, w = o_ref.shape                                 # w == 128
    r0 = pl.program_id(0) * tr
    row = jax.lax.broadcasted_iota(jnp.int32, (tr, 1), 0) + r0
    lane = jax.lax.broadcasted_iota(jnp.int32, (1, w), 1)
    idx = row * w + lane                                # global flat index (int32)
    pos = (idx // d_model).astype(jnp.float32)
    col = idx % d_model
    pair = (col // 2) * 2
    inv_denom = jnp.exp(pair.astype(jnp.float32) * jnp.float32(-_LN10000 / d_model))
    arg = pos * inv_denom
    o_ref[...] = jnp.where((col % 2) == 0, jnp.sin(arg), jnp.cos(arg)).astype(o_ref.dtype)


# --------------------------------------------------------------------------
# Wrapper helpers
# --------------------------------------------------------------------------
def _make_consts(col_i32, sub_pos_i32, d_model):
    """(3, W) f32 constants [inv_denom, sub_pos, is_even], built like the reference."""
    pair = (col_i32 // 2) * 2
    denom = jnp.power(jnp.float32(10000.0),
                      pair.astype(jnp.float32) / jnp.float32(d_model))
    inv_denom = jnp.float32(1.0) / denom
    is_even = (col_i32 % 2 == 0).astype(jnp.float32)
    return jnp.stack([inv_denom, sub_pos_i32.astype(jnp.float32), is_even], axis=0)


def _pick_row_tile(total_rows, row_bytes, requested=None, target_bytes=6 << 20):
    """Largest sublane-aligned row tile within a ~6 MiB VMEM budget.

    12 MiB double-buffered output fits the smallest default scoped VMEM limit
    (v5e 16 MiB) and leaves ample headroom on v7x (64 MiB physical).  When the
    whole output would fit in one block, split it so the grid has >= 2 steps
    and both v7x TensorCores get work.
    """
    cap = max(8, ((target_bytes // row_bytes) // 8) * 8)
    if requested is not None:
        t = min(int(requested), total_rows, cap)
    else:
        t = min(total_rows, cap)
        if t >= total_rows and total_rows > 8:
            half = (total_rows + 1) // 2
            t = min(cap, ((half + 7) // 8) * 8)
    if t >= total_rows:
        return total_rows
    return max(8, (t // 8) * 8)


# --------------------------------------------------------------------------
# Public entry point
# --------------------------------------------------------------------------
def positional_encoding(d_model: int, max_sequence_length: int, *,
                        row_tile=None, out_dtype=jnp.float32):
    """Returns the PE table of shape (max_sequence_length, d_model)."""
    D, L = int(d_model), int(max_sequence_length)
    assert D % 2 == 0, "d_model must be even (matches torch interleaving)"
    assert L >= 1
    assert L <= (1 << 24), "positions must stay exactly representable in f32"
    assert L * D <= (1 << 30), "int32 flat-index headroom"
    compiler_params = pltpu.CompilerParams(dimension_semantics=("parallel",))

    if D % 128 == 0:
        # Natural (TILE_L, D) blocks: already 128-lane dense, unmasked stores.
        col = jnp.arange(D, dtype=jnp.int32)
        consts = _make_consts(col, jnp.zeros((D,), jnp.int32), D)
        tl = _pick_row_tile(L, D * 4, row_tile)
        return pl.pallas_call(
            functools.partial(_pe_const_kernel, per_row=1),
            out_shape=jax.ShapeDtypeStruct((L, D), out_dtype),
            grid=(pl.cdiv(L, tl),),
            in_specs=[pl.BlockSpec((3, D), lambda i: (0, 0))],
            out_specs=pl.BlockSpec((tl, D), lambda i: (i, 0)),
            compiler_params=compiler_params,
        )(consts)

    # Flat lane-dense slab: pad L so the row-major-flattened table fills whole
    # 128-lane rows, emit (R, 128), reshape/slice in the wrapper.
    chunk = 128 // math.gcd(D, 128)            # PE-row granularity of whole slab rows
    L_pad = ((L + chunk - 1) // chunk) * chunk
    R = (L_pad * D) // 128
    tr = _pick_row_tile(R, 128 * 4, row_tile)
    grid = (pl.cdiv(R, tr),)
    out_spec = pl.BlockSpec((tr, 128), lambda i: (i, 0))
    out_shape = jax.ShapeDtypeStruct((R, 128), out_dtype)

    if 128 % D == 0:
        # Per-lane constants exist: col = lane % D, sub_pos = lane // D.
        lane = jnp.arange(128, dtype=jnp.int32)
        consts = _make_consts(lane % D, lane // D, D)
        flat = pl.pallas_call(
            functools.partial(_pe_const_kernel, per_row=128 // D),
            out_shape=out_shape,
            grid=grid,
            in_specs=[pl.BlockSpec((3, 128), lambda i: (0, 0))],
            out_specs=out_spec,
            compiler_params=compiler_params,
        )(consts)
    else:
        # General even D (e.g. 48, 96, 192): per-element div/mod by a constant.
        flat = pl.pallas_call(
            functools.partial(_pe_flat_general_kernel, d_model=D),
            out_shape=out_shape,
            grid=grid,
            out_specs=out_spec,
            compiler_params=compiler_params,
        )()

    # Row-major (R, 128) -> (L_pad, D) is a pure metadata reshape for the
    # default layout (same HBM bytes); only padded rows (if any) are sliced.
    pe = flat.reshape(L_pad, D)
    return pe if L_pad == L else pe[:L]


# --------------------------------------------------------------------------
# Pure-JAX reference (mirrors the torch forward exactly)
# --------------------------------------------------------------------------
def _positional_encoding_ref(d_model: int, max_sequence_length: int) -> jax.Array:
    idx = jnp.arange(0, d_model, 2).astype(jnp.float32)
    denominator = jnp.power(jnp.float32(10000.0), idx / jnp.float32(d_model))
    position = jnp.arange(max_sequence_length, dtype=jnp.float32).reshape(-1, 1)
    even_pe = jnp.sin(position / denominator)
    odd_pe = jnp.cos(position / denominator)
    stack = jnp.stack([even_pe, odd_pe], axis=2)            # (L, d_model/2, 2)
    return stack.reshape(max_sequence_length, d_model)


if __name__ == "__main__":
    _ = jax.random.PRNGKey(0)  # the module's forward() takes no tensor inputs

    cases = [
        # flat per-lane-const path (128 % D == 0), single block
        dict(d_model=32, max_sequence_length=8),
        # flat per-lane-const path, multiple tiles incl. a partial last block
        dict(d_model=32, max_sequence_length=40, row_tile=8),
        # flat per-lane-const path needing row padding + wrapper slice (L*D % 128 != 0)
        dict(d_model=32, max_sequence_length=7),
        # natural path (D % 128 == 0), auto-split so the grid has >= 2 steps
        dict(d_model=128, max_sequence_length=24),
        # natural path with an explicit row tile
        dict(d_model=256, max_sequence_length=40, row_tile=16),
        # general flat path: D neither a multiple nor a divisor of 128
        dict(d_model=48, max_sequence_length=100),
    ]
    for c in cases:
        pe = jax.block_until_ready(positional_encoding(**c))
        ref = _positional_encoding_ref(c["d_model"], c["max_sequence_length"])
        assert pe.shape == ref.shape, f"shape mismatch for {c}"
        assert pe.dtype == jnp.float32
        # Tolerance scales with |argument| ~ position: a few f32 ulps of the
        # reciprocal/exp recipe amplify linearly with the position magnitude.
        tol = max(1e-5, 4e-7 * c["max_sequence_length"])
        assert jnp.allclose(pe, ref, atol=tol, rtol=1e-5), f"value mismatch for {c}"

    # Optional bf16 output (writeback/VALU saver on v6e/v7x) — loose check.
    pe16 = jax.block_until_ready(
        positional_encoding(64, 16, out_dtype=jnp.bfloat16))
    ref16 = _positional_encoding_ref(64, 16)
    assert pe16.dtype == jnp.bfloat16 and pe16.shape == ref16.shape
    assert jnp.allclose(pe16.astype(jnp.float32), ref16, atol=2e-2)

    print("KERNEL_OK")
</pallas_src>

<mosaic_0001>
module attributes {stable_mosaic.version = 11 : i64} {
  func.func @_pe_const_kernel(%arg0: i32, %arg1: memref<3x128xf32, #tpu.memory_space<vmem>>, %arg2: memref<2x128xf32, #tpu.memory_space<vmem>>) attributes {dimension_semantics = [#tpu.dimension_semantics<parallel>], iteration_bounds = array<i64: 1>, scalar_prefetch = 0 : i64, scratch_operands = 0 : i64, tpu.core_type = #tpu.core_type<tc>, window_params = [{pipeline_mode = #tpu.pipeline_mode<synchronous>, transform_indices = @transform_0, window_bounds = array<i64: 3, 128>}, {transform_indices = @transform_1, window_bounds = array<i64: 2, 128>}]} {
    %c0 = arith.constant 0 : index
    %c0_0 = arith.constant 0 : index
    %0 = vector.load %arg1[%c0, %c0_0] : memref<3x128xf32, #tpu.memory_space<vmem>>, vector<1x128xf32>
    %c1 = arith.constant 1 : index
    %c0_1 = arith.constant 0 : index
    %1 = vector.load %arg1[%c1, %c0_1] : memref<3x128xf32, #tpu.memory_space<vmem>>, vector<1x128xf32>
    %c2 = arith.constant 2 : index
    %c0_2 = arith.constant 0 : index
    %2 = vector.load %arg1[%c2, %c0_2] : memref<3x128xf32, #tpu.memory_space<vmem>>, vector<1x128xf32>
    %cst = arith.constant 5.000000e-01 : f32
    %3 = vector.broadcast %cst : f32 to vector<1x128xf32>
    %4 = arith.cmpf ogt, %2, %3 : vector<1x128xf32>
    %c2_i32 = arith.constant 2 : i32
    %5 = arith.muli %arg0, %c2_i32 : i32
    %6 = tpu.iota {dimensions = array<i32: 0>} : vector<2x1xi32>
    %7 = vector.broadcast %5 : i32 to vector<2x1xi32>
    %8 = arith.addi %6, %7 : vector<2x1xi32>
    %9 = arith.sitofp %8 : vector<2x1xi32> to vector<2x1xf32>
    %cst_3 = arith.constant 4.000000e+00 : f32
    %10 = vector.broadcast %cst_3 : f32 to vector<2x1xf32>
    %11 = arith.mulf %9, %10 : vector<2x1xf32>
    %12 = vector.broadcast %11 : vector<2x1xf32> to vector<2x128xf32>
    %13 = vector.broadcast %1 : vector<1x128xf32> to vector<2x128xf32>
    %14 = arith.addf %12, %13 : vector<2x128xf32>
    %15 = vector.broadcast %0 : vector<1x128xf32> to vector<2x128xf32>
    %16 = arith.mulf %14, %15 : vector<2x128xf32>
    %17 = math.sin %16 : vector<2x128xf32>
    %18 = math.cos %16 : vector<2x128xf32>
    %19 = vector.shape_cast %4 : vector<1x128xi1> to vector<1x128xi1>
    %20 = vector.broadcast %19 : vector<1x128xi1> to vector<2x128xi1>
    %21 = arith.select %20, %17, %18 : vector<2x128xi1>, vector<2x128xf32>
    %c0_4 = arith.constant 0 : index
    %c0_5 = arith.constant 0 : index
    %22 = vector.load %arg2[%c0_4, %c0_5] : memref<2x128xf32, #tpu.memory_space<vmem>>, vector<2x128xf32>
    tpu.vector_store %arg2[%c0_4, %c0_5], %21 {strides = array<i32>} : memref<2x128xf32, #tpu.memory_space<vmem>>, vector<2x128xf32>,
    return
  }
  func.func @transform_0(%arg0: i32) -> (i32, i32) {
    %c0_i32 = arith.constant 0 : i32
    %c0_i32_0 = arith.constant 0 : i32
    %c0_i32_1 = arith.constant 0 : i32
    return %c0_i32, %c0_i32_0 : i32, i32
  }
  func.func @transform_1(%arg0: i32) -> (i32, i32) {
    %c0_i32 = arith.constant 0 : i32
    %c0_i32_0 = arith.constant 0 : i32
    return %arg0, %c0_i32 : i32, i32
  }
}

</mosaic_0001>

<bundles_post_ra>
// kernel: tpu_custom_call.1
= control target key start
LH: loop header
LB: loop body
LE: loop exit
PB: predicated region body
PF: predicated region fallthrough
CT: control target
= control target key end

     0   :  { %6 = vsyncpa [#allocation3], 0  ;;  %s514_s0 = inlined_call_operand.hbm [shape: f32[3,128], index: 0, kind: input, shape index: {}]   ;;  %s515_s1 = inlined_call_operand.hbm [shape: f32[2,128], index: 1, kind: output, shape index: {}]  }
   0x1   :  { %7 = vsyncpa [#allocation4], 0  ;;  %s13_s8 = sshll.u32 %s514_s0, 4  ;;  %s438_s9 = smov [#allocation2]   ;;  %s14_s8 = int_to_ptr.hbm [resolvable:$true] %s13_s8 }
   0x2   :  { %s15_s10 = sshll.u32 %s438_s9, 4  ;;  %s16_s10 = int_to_ptr.vmem [resolvable:$true] %s15_s10 }
   0x3   :  { %18 = dma.hbm_to_vmem [thread:$0]  %s14_s8, 64, %s16_s10, [#allocation3]  }
   0x4   :  { %434 = dma.done.wait [#allocation3], 64  }
   0x5   :  { %435 = vsyncadd [#allocation3], 4294967232  ;;  %v28_v0 = vlaneseq  ;;  %v384_v4 = vld [vmem:[#allocation2 + $0x1] ss:$0 sm:$0xff]  ;;  %v385_v5 = vld [vmem:[#allocation2] ss:$0 sm:$0xff] }
   0x6   :  { %v439_v19 = vmov 683565275   ;;  %v440_v21 = vmov 2475754826   ;;  %v441_v23 = vmov 2131351028  }
   0x7   :  { %v29_v1 = vshrl.u32 %v28_v0, 7  ;;  %v442_v25 = vmov 2102212464   ;;  %v443_v27 = vmov 920167782   ;;  %s446_s0 = smov [#allocation5]  }
   0x8   :  { %v444_v33 = vmov 1326507024   ;;  %s357_s11 = sshll.u32 %s446_s0, 4  ;;  %s359_s14 = sshll.u32 %s515_s1, 4  ;;  %s358_s11 = int_to_ptr.vmem [resolvable:$true] %s357_s11  ;;  %s360_s14 = int_to_ptr.hbm [resolvable:$true] %s359_s14 }
   0x9   :  { %v32_v2 = vcvt.s32.f32 %v29_v1 }
   0xb   :  { %v33_v3 = vmul.f32 4.0, %v32_v2 }
   0xd   :  { %v35_v6 = vadd.f32 %v384_v4, %v33_v3 }
   0xf   :  { %v460_v7 = vmul.f32 %v385_v5, %v35_v6 }
  0x11   :  { %v41_v8 = vand.u32 2139095040, %v460_v7  ;;  %v38_v10 = vand.u32 2147483647, %v460_v7  ;;  %vm40_vm12 = vcmp.lt.s32.totalorder %v460_v7, 0 }
  0x13   :  { %v42_v9 = vshrl.u32 %v41_v8, 23  ;;  %v45_v13 = vand.u32 8388607, %v38_v10  ;;  %v445_v8 = vmov 0   ;;  %vm39_vm13 = vcmp.le.f32.partialorder %v38_v10, 0.7853982 }
  0x15   :  { %v369_v11 = vadd.s32 4294967169, %v42_v9  ;;  %v46_v16 = vor.u32 8388608, %v45_v13 }
  0x17   :  { %v48_v12 = vadd.s32 1, %v369_v11  ;;  %v469_v35 = vshll.u32 %v46_v16, 8 }
  0x19   :  { %vm49_vm0 = vcmp.gt.s32.totalorder %v48_v12, 0  ;;  %v87_v47 = vand.u32 65535, %v469_v35  ;;  %v88_v48 = vshrl.u32 %v469_v35, 16 }
  0x1a   :  { %v50_v14 = vsel %vm49_vm0, %v48_v12, 0 }
  0x1b   :  { %v52_v15 = vand.u32 31, %v50_v14  ;;  %v466_v17 = vshrl.u32 %v50_v14, 5 }
  0x1d   :  { %v53_v18 = vsub.s32 32, %v52_v15  ;;  %v55_v20 = vshll.u32 %v439_v19, %v52_v15  ;;  %v58_v22 = vshll.u32 %v440_v21, %v52_v15  ;;  %v61_v24 = vshll.u32 %v441_v23, %v52_v15 }
  0x1e   :  { %v64_v26 = vshll.u32 %v442_v25, %v52_v15  ;;  %v67_v28 = vshll.u32 %v443_v27, %v52_v15  ;;  %vm70_vm1 = vcmp.lt.s32.totalorder %v466_v17, 1  ;;  %vm73_vm2 = vcmp.lt.s32.totalorder %v466_v17, 4 }
  0x1f   :  { %v56_v29 = vshrl.u32 %v440_v21, %v53_v18  ;;  %v59_v30 = vshrl.u32 %v441_v23, %v53_v18  ;;  %v62_v31 = vshrl.u32 %v442_v25, %v53_v18  ;;  %v65_v32 = vshrl.u32 %v443_v27, %v53_v18 }
  0x20   :  { %v68_v34 = vshrl.u32 %v444_v33, %v53_v18  ;;  %vm72_vm3 = vcmp.lt.s32.totalorder %v466_v17, 3  ;;  %vm71_vm4 = vcmp.lt.s32.totalorder %v466_v17, 2  ;;  %v54_v55 = vshrl.u32 %v439_v19, %v53_v18 }
  0x21   :  { %v57_v36 = vor.u32 %v56_v29, %v55_v20  ;;  %v60_v37 = vor.u32 %v59_v30, %v58_v22  ;;  %v63_v38 = vor.u32 %v62_v31, %v61_v24  ;;  %v66_v39 = vor.u32 %v65_v32, %v64_v26 }
  0x22   :  { %v69_v40 = vor.u32 %v68_v34, %v67_v28 }
  0x23   :  { %v78_v41 = vsel %vm70_vm1, %v57_v36, %v60_v37  ;;  %v82_v42 = vsel %vm70_vm1, %v60_v37, %v63_v38  ;;  %v79_v43 = vsel %vm73_vm2, %v66_v39, 920167782  ;;  %v74_v4 = vsel %vm70_vm1, %v54_v55, %v57_v36 }
  0x24   :  { %v83_v44 = vsel %vm73_vm2, %v69_v40, 1326507024  ;;  %v80_v45 = vsel %vm72_vm3, %v63_v38, %v79_v43  ;;  %v75_v6 = vsel %vm73_vm2, %v63_v38, 2102212464 }
  0x25   :  { %v84_v46 = vsel %vm72_vm3, %v66_v39, %v83_v44  ;;  %v81_v49 = vsel %vm71_vm4, %v78_v41, %v80_v45  ;;  %v76_v19 = vsel %vm72_vm3, %v60_v37, %v75_v6 }
  0x26   :  { %v85_v50 = vsel %vm71_vm4, %v82_v42, %v84_v46  ;;  %v111_v53 = vand.u32 65535, %v81_v49  ;;  %v112_v54 = vshrl.u32 %v81_v49, 16  ;;  %v77_v27 = vsel %vm71_vm4, %v74_v4, %v76_v19 }
  0x27   :  { %v89_v51 = vand.u32 65535, %v85_v50  ;;  %v90_v52 = vshrl.u32 %v85_v50, 16  ;;  %v131_v31 = vmul.u32 %v469_v35, %v77_v27 }
  0x28   :  { %v113_v59 = vmul.u32 %v111_v53, %v87_v47  ;;  %v114_v60 = vmul.u32 %v112_v54, %v87_v47  ;;  %v115_v61 = vmul.u32 %v111_v53, %v88_v48  ;;  %v116_v1 = vmul.u32 %v112_v54, %v88_v48 }
  0x29   :  { %v91_v56 = vmul.u32 %v89_v51, %v87_v47  ;;  %v92_v57 = vmul.u32 %v90_v52, %v87_v47  ;;  %v93_v58 = vmul.u32 %v89_v51, %v88_v48  ;;  %v94_v62 = vmul.u32 %v90_v52, %v88_v48 }
  0x2a   :  { %v117_v2 = vshll.u32 %v114_v60, 16  ;;  %v119_v3 = vshll.u32 %v115_v61, 16  ;;  %v118_v16 = vshrl.u32 %v114_v60, 16  ;;  %v120_v23 = vshrl.u32 %v115_v61, 16 }
  0x2b   :  { %v95_v63 = vshll.u32 %v92_v57, 16  ;;  %v97_v0 = vshll.u32 %v93_v58, 16  ;;  %v96_v12 = vshrl.u32 %v92_v57, 16  ;;  %v98_v20 = vshrl.u32 %v93_v58, 16 }
  0x2c   :  { %vm121_vm6 = vc.u32 %v113_v59, %v117_v2  ;;  %v123_v11 = vadd.s32 %v117_v2, %v113_v59  ;;  %v25_v2 = vld [vmem:[#allocation2 + $0x2] sm:$0x1] }
  0x2d   :  { %vm99_vm5 = vc.u32 %v91_v56, %v95_v63  ;;  %v101_v5 = vadd.s32 %v95_v63, %v91_v56  ;;  %v122_v14 = vsel %vm121_vm6, 1, %v445_v8  ;;  %vm26_vm14 = vcmp.gt.f32.partialorder %v25_v2, 0.5 }
  0x2e   :  { %v100_v9 = vsel %vm99_vm5, 1, %v445_v8  ;;  %v124_v18 = vadd.s32 %v122_v14, %v116_v1  ;;  %vm125_vm8 = vc.u32 %v123_v11, %v119_v3  ;;  %v127_v26 = vadd.s32 %v123_v11, %v119_v3 }
  0x2f   :  { %v102_v13 = vadd.s32 %v100_v9, %v94_v62  ;;  %vm103_vm7 = vc.u32 %v101_v5, %v97_v0  ;;  %v126_v22 = vsel %vm125_vm8, 1, %v445_v8  ;;  %v347_v14 = vsel %vm26_vm14, 1, %v445_v8 }
  0x30   :  { %v104_v15 = vsel %vm103_vm7, 1, %v445_v8  ;;  %v128_v24 = vadd.s32 %v126_v22, %v124_v18  ;;  %vm181_vm5 = vweird.f32 %v460_v7 }
  0x31   :  { %v106_v21 = vadd.s32 %v104_v15, %v102_v13 }
  0x32   :  { %v129_v28 = vadd.s32 %v128_v24, %v118_v16 }
  0x33   :  { %v107_v25 = vadd.s32 %v106_v21, %v96_v12 }
  0x34   :  { %v130_v30 = vadd.s32 %v129_v28, %v120_v23 }
  0x35   :  { %v108_v29 = vadd.s32 %v107_v25, %v98_v20  ;;  %v348_v20 = vperm.slane %v347_v14, 0 }
  0x36   :  { %v134_v32 = vadd.s32 1, %v130_v30 }
  0x37   :  { %vm133_vm9 = vc.u32 %v108_v29, %v127_v26  ;;  %v132_v17 = vadd.s32 %v127_v26, %v108_v29  ;;  %vm349_vm6 = vcmp.eq.s32.totalorder %v348_v20, 1 }
  0x38   :  { %v135_v33 = vsel %vm133_vm9, %v134_v32, %v130_v30 }
  0x39   :  { %v136_v34 = vadd.s32 %v135_v33, %v131_v31 }
  0x3b   :  { %v137_v36 = vadd.s32 536870912, %v136_v34 }
  0x3d   :  { %v138_v37 = vshrl.u32 %v137_v36, 30 }
  0x3f   :  { %v139_v38 = vshll.u32 %v138_v37, 30  ;;  %v162_v55 = vsub.s32 4, %v138_v37 }
  0x41   :  { %v140_v39 = vsub.s32 %v136_v34, %v139_v38  ;;  %v163_v58 = vsel %vm40_vm12, %v162_v55, %v138_v37 }
  0x42   :  { %v165_v61 = vsel %vm39_vm13, 0, %v163_v58 }
  0x43   :  { %vm141_vm10 = vcmp.lt.s32.totalorder %v140_v39, 0  ;;  %v142_v40 = vsub.s32 0, %v140_v39  ;;  %v182_v3 = vadd.s32 3, %v165_v61  ;;  %v337_v10 = vand.u32 3, %v165_v61 }
  0x45   :  { %v143_v41 = vsel %vm141_vm10, %v142_v40, %v140_v39  ;;  %v183_v11 = vand.u32 3, %v182_v3  ;;  %vm342_vm0 = vcmp.eq.s32.totalorder %v337_v10, 2  ;;  %vm339_vm3 = vcmp.eq.s32.totalorder %v337_v10, 0 }
  0x46   :  { %v144_v42 = vclz %v143_v41  ;;  %vm338_vm4 = vcmp.lt.s32.totalorder %v337_v10, 2 }
  0x47   :  { %vm188_vm15 = vcmp.eq.s32.totalorder %v183_v11, 2  ;;  %vm184_vm1 = vcmp.lt.s32.totalorder %v183_v11, 2  ;;  %vm185_vm2 = vcmp.eq.s32.totalorder %v183_v11, 0 }
  0x48   :  { %v370_v43 = vadd.s32 4294967294, %v144_v42 }
  0x4a   :  { %vm371_vm11 = vcmp.lt.s32.totalorder %v370_v43, 0 }
  0x4b   :  { %v147_v44 = vsel %vm371_vm11, 0, %v370_v43 }
  0x4c   :  { %v148_v45 = vsub.s32 32, %v147_v44  ;;  %v149_v46 = vshll.u32 %v140_v39, %v147_v44  ;;  %v152_v47 = vsub.s32 4294967266, %v147_v44 }
  0x4e   :  { %v150_v35 = vshrl.u32 %v132_v17, %v148_v45  ;;  %v153_v48 = vadd.s32 127, %v152_v47 }
  0x50   :  { %v151_v49 = vor.u32 %v150_v35, %v149_v46  ;;  %v154_v50 = vshll.u32 %v153_v48, 23 }
  0x52   :  { %v155_v51 = vor.u32 4788187, %v154_v50  ;;  %v158_v52 = vcvt.s32.f32 %v151_v49 }
  0x54   :  { %v156_v53 = vand.u32 2147483647, %v155_v51 }
  0x56   :  { %v159_v54 = vmul.f32 %v158_v52, %v156_v53 }
  0x58   :  { %v160_v56 = vxor.u32 2147483648, %v159_v54 }
  0x5a   :  { %v161_v57 = vsel %vm40_vm12, %v160_v56, %v159_v54 }
  0x5b   :  { %v164_v59 = vsel %vm39_vm13, %v460_v7, %v161_v57 }
  0x5c   :  { %v166_v60 = vmul.f32 %v164_v59, %v164_v59 }
  0x5e   :  { %v167_v62 = vmul.f32 -0.001358992, %v166_v60  ;;  %v174_v63 = vmul.f32 -0.00019511016, %v166_v60 }
  0x60   :  { %v168_v0 = vadd.f32 0.041655596, %v167_v62  ;;  %v175_v1 = vadd.f32 0.008332121, %v174_v63 }
  0x62   :  { %v169_v4 = vmul.f32 %v168_v0, %v166_v60  ;;  %v176_v5 = vmul.f32 %v175_v1, %v166_v60 }
  0x64   :  { %v170_v6 = vadd.f32 -0.4999988, %v169_v4  ;;  %v177_v9 = vadd.f32 -0.16666654, %v176_v5 }
  0x66   :  { %v171_v12 = vmul.f32 %v170_v6, %v166_v60  ;;  %v178_v13 = vmul.f32 %v177_v9, %v166_v60 }
  0x68   :  { %v172_v15 = vadd.f32 1.0, %v171_v12  ;;  %v179_v16 = vadd.f32 1.0, %v178_v13 }
  0x6a   :  { %v180_v18 = vmul.f32 %v179_v16, %v164_v59  ;;  %v189_v19 = vxor.u32 2147483648, %v172_v15 }
  0x6c   :  { %v186_v21 = vxor.u32 2147483648, %v180_v18  ;;  %v190_v22 = vsel %vm188_vm15, %v189_v19, %v180_v18  ;;  %v344_v23 = vsel %vm342_vm0, %v189_v19, %v180_v18 }
  0x6e   :  { %v187_v8 = vsel %vm185_vm2, %v172_v15, %v186_v21  ;;  %v341_v24 = vsel %vm339_vm3, %v172_v15, %v186_v21 }
  0x6f   :  { %v191_v25 = vsel %vm184_vm1, %v187_v8, %v190_v22  ;;  %v345_v26 = vsel %vm338_vm4, %v341_v24, %v344_v23 }
  0x70   :  { %v192_v27 = vsel %vm181_vm5, nan, %v191_v25  ;;  %v346_v28 = vsel %vm181_vm5, nan, %v345_v26 }
  0x71   :  { %v350_v29 = vsel %vm349_vm6, %v192_v27, %v346_v28 }
  0x72   :  { %351 = vst [vmem:[#allocation5] sm:$0x3] %v350_v29 }
  0x73   :  { %362 = dma.vmem_to_hbm [thread:$0]  %s358_s11, 32, %s360_s14, [#allocation4]  }
  0x74   :  { %436 = dma.done.wait [#allocation4], 32  }
  0x75   :  { %437 = vsyncadd [#allocation4], 4294967264 }
  0x76   :  { %367 = vsyncpa [#allocation3], 1 }
  0x77   :  { %368 = vsyncpa [#allocation4], 1 }

</bundles_post_ra>
